<compile_context>
chip_gen: v7x
topology: tpu7x:2x2x1
jax: 0.10.0
libtpu: 0.0.40
codegen_flags: <defaults>
</compile_context>

<pallas_src>
import jax
import jax.numpy as jnp
from jax import lax
from jax.experimental import pallas as pl
from jax.experimental.pallas import tpu as pltpu


def _round_up(x: int, m: int) -> int:
    return (x + m - 1) // m * m


# -----------------------------------------------------------------------------
# Path 1: dense, vectorized one-hot MXU gather (small / moderate vocab).
# -----------------------------------------------------------------------------
def _onehot_gather_kernel(labels_ref, table_ref, out_ref):
    """One D-tile of embeddings for the whole batch via a one-hot MXU dot.

    labels_ref : VMEM (B, 1) int32  -- final (post CFG-drop, clamped) class ids
    table_ref  : VMEM (V, TILE_D)   -- embedding-table tile for this D slice
    out_ref    : VMEM (B, TILE_D)
    """
    b = out_ref.shape[0]
    v = table_ref.shape[0]
    class_iota = lax.broadcasted_iota(jnp.int32, (b, v), 1)
    # Build the one-hot in f32 (v5e VPU has no bf16 path), then cast for MXU.
    onehot = (class_iota == labels_ref[...]).astype(jnp.float32)
    onehot = onehot.astype(table_ref.dtype)
    acc = jnp.dot(onehot, table_ref[...], preferred_element_type=jnp.float32)
    out_ref[...] = acc.astype(out_ref.dtype)


def _pick_tile_d(d_pad, v, b, itemsize, budget_bytes):
    """Largest multiple-of-128 divisor of d_pad whose double-buffered residency
    (table tile + output tile + labels) fits the VMEM budget.  Prefers a single
    grid step (tile_d == d_pad) so the ~0.35us/step pipeline overhead vanishes
    for small-vocab class embeddings."""

    def residency(tile):
        # 2x double-buffered table tile + 2x output tile + tiny labels input.
        return 2 * (v + b) * tile * itemsize + 2 * b * 4

    if residency(d_pad) <= budget_bytes:
        return d_pad
    tile = d_pad - 128
    while tile >= 128:
        if d_pad % tile == 0 and residency(tile) <= budget_bytes:
            return tile
        tile -= 128
    return 128  # smallest lane-dense tile


def _onehot_gather(labels2d, table, b, v, d_pad, vmem_budget_bytes):
    itemsize = table.dtype.itemsize
    tile_d = _pick_tile_d(d_pad, v, b, itemsize, vmem_budget_bytes)
    n_steps = d_pad // tile_d
    # v7x has 2 TensorCores: only split the D grid when there is enough work
    # to amortize the second per-core launch; otherwise keep one core.
    semantics = "parallel" if (n_steps >= 8 and n_steps % 2 == 0) else "arbitrary"

    cost = pl.CostEstimate(
        flops=2 * b * v * d_pad,
        transcendentals=0,
        bytes_accessed=(v * d_pad + b * d_pad) * itemsize + b * 4,
    )
    grid_spec = pltpu.PrefetchScalarGridSpec(
        num_scalar_prefetch=0,
        grid=(n_steps,),
        in_specs=[
            pl.BlockSpec((b, 1), lambda j: (0, 0)),       # labels (tiny, reused)
            pl.BlockSpec((v, tile_d), lambda j: (0, j)),  # table D tile
        ],
        out_specs=pl.BlockSpec((b, tile_d), lambda j: (0, j)),
    )
    return pl.pallas_call(
        _onehot_gather_kernel,
        out_shape=jax.ShapeDtypeStruct((b, d_pad), table.dtype),
        grid_spec=grid_spec,
        compiler_params=pltpu.CompilerParams(dimension_semantics=(semantics,)),
        cost_estimate=cost,
    )(labels2d, table)


# -----------------------------------------------------------------------------
# Path 2: manual HBM row-gather DMA (large vocab, small batch) -- moves only
# B*D bytes instead of streaming the whole V*D table through VMEM.
# -----------------------------------------------------------------------------
def _dma_gather_kernel(labels_ref, table_hbm, out_ref, sem):
    """Row gather via B in-flight HBM->VMEM DMAs (one per batch element).

    labels_ref : SMEM (B,) int32 (scalar-prefetched)
    table_hbm  : HBM  (V, DW) uint32 (memory_space=pl.ANY; 32-bit word view)
    out_ref    : VMEM (B, DW) uint32
    sem        : DMA semaphore array (B,)
    """
    b = out_ref.shape[0]

    def issue(i, carry):
        pltpu.make_async_copy(
            table_hbm.at[labels_ref[i]], out_ref.at[i], sem.at[i]
        ).start()
        return carry

    lax.fori_loop(0, b, issue, 0)

    def drain(i, carry):
        pltpu.make_async_copy(
            table_hbm.at[labels_ref[i]], out_ref.at[i], sem.at[i]
        ).wait()
        return carry

    lax.fori_loop(0, b, drain, 0)


def _dma_gather(labels1d, table, b, v, d_pad):
    itemsize = table.dtype.itemsize
    pack = 4 // itemsize  # table elements per 32-bit DMA word
    d_words = d_pad // pack
    if pack > 1:
        table_w = lax.bitcast_convert_type(
            table.reshape(v, d_words, pack), jnp.uint32
        )
    else:
        table_w = lax.bitcast_convert_type(table, jnp.uint32)

    cost = pl.CostEstimate(
        flops=0,
        transcendentals=0,
        bytes_accessed=2 * b * d_pad * itemsize + b * 4,
    )
    grid_spec = pltpu.PrefetchScalarGridSpec(
        num_scalar_prefetch=1,  # final labels -> SMEM
        grid=(1,),
        in_specs=[pl.BlockSpec(memory_space=pl.ANY)],  # table stays in HBM
        out_specs=pl.BlockSpec((b, d_words), lambda i, lbl: (0, 0)),
        scratch_shapes=[pltpu.SemaphoreType.DMA((b,))],
    )
    out_w = pl.pallas_call(
        _dma_gather_kernel,
        out_shape=jax.ShapeDtypeStruct((b, d_words), jnp.uint32),
        grid_spec=grid_spec,
        compiler_params=pltpu.CompilerParams(dimension_semantics=("arbitrary",)),
        cost_estimate=cost,
    )(labels1d, table_w)

    out = lax.bitcast_convert_type(out_w, table.dtype)
    if pack > 1:
        out = out.reshape(b, d_pad)
    return out


# -----------------------------------------------------------------------------
# Forward wrapper (matches LabelEmbed.forward semantics).
# -----------------------------------------------------------------------------
def label_embed_forward(
    labels,
    embedding_table,
    *,
    num_classes,
    dropout_prob,
    train,
    rng=None,
    force_drop_ids=None,
    gather="auto",  # "auto" | "onehot" | "dma"
    vmem_budget_bytes=12 * 1024 * 1024,
):
    """Pallas equivalent of LabelEmbed.forward. Returns (embeddings, drop_ids)."""
    b = labels.shape[0]
    v, d = embedding_table.shape
    use_dropout = dropout_prob > 0

    if force_drop_ids is not None and not use_dropout:
        # Intentional difference vs. PyTorch (which would silently index a
        # non-existent CFG row): the table has no row `num_classes`.
        raise ValueError(
            "force_drop_ids requires dropout_prob > 0: the embedding table has "
            "no CFG 'null' row for class id == num_classes."
        )

    # --- CFG token drop, fused into the wrapper (trivial (B,) vector op) -----
    labels = labels.astype(jnp.int32)
    if (train and use_dropout) or (force_drop_ids is not None):
        if force_drop_ids is None:
            if rng is None:
                raise ValueError("rng is required when train=True and dropout_prob > 0")
            drop = jax.random.uniform(rng, (b,), dtype=jnp.float32) < dropout_prob
        else:
            drop = force_drop_ids == 1
        final_labels = jnp.where(drop, jnp.int32(num_classes), labels)
        drop_ids = drop.astype(jnp.int32)
    else:
        final_labels = labels
        drop_ids = jnp.zeros((b,), dtype=jnp.int32)

    # jnp.take-like safety: the in-kernel gathers have no bounds check.
    final_labels = jnp.clip(final_labels, 0, v - 1)

    # --- lane-dense D (skip pad/slice round trip when already aligned) -------
    d_pad = _round_up(d, 128)
    table = embedding_table
    if d_pad != d:
        table = jnp.pad(table, ((0, 0), (0, d_pad - d)))

    itemsize = table.dtype.itemsize
    table_bytes = v * d_pad * itemsize
    gathered_bytes = b * d_pad * itemsize
    dma_ok = itemsize in (1, 2, 4) and d_pad % (4 // itemsize) == 0
    dma_fits = 2 * b * d_pad * itemsize <= vmem_budget_bytes  # dbl-buffered out

    if gather == "auto":
        use_dma = (
            dma_ok
            and dma_fits
            and table_bytes > max(8 * gathered_bytes, 4 * 1024 * 1024)
        )
    elif gather == "dma":
        if not (dma_ok and dma_fits):
            raise ValueError("DMA gather path unavailable for this dtype/shape")
        use_dma = True
    elif gather == "onehot":
        use_dma = False
    else:
        raise ValueError(f"unknown gather mode: {gather!r}")

    if use_dma:
        out = _dma_gather(final_labels, table, b, v, d_pad)
    else:
        out = _onehot_gather(
            final_labels.reshape(b, 1), table, b, v, d_pad, vmem_budget_bytes
        )

    if d_pad != d:
        out = out[:, :d]
    return out, drop_ids


if __name__ == "__main__":
    # Small, deterministic config consistent with the module's __init__.
    embed_dim = 384          # multiple of 128 -> no pad/slice round trip
    num_classes = 10
    dropout_prob = 0.1
    vocab = num_classes + (1 if dropout_prob > 0 else 0)  # 11
    batch = 8

    key = jax.random.PRNGKey(0)
    k_table, k_labels, k_drop = jax.random.split(key, 3)

    # nn.Embedding weight analogue, stored in bf16 (halves HBM traffic; the
    # gather / one-hot dot is exact in any dtype).
    embedding_table = (
        jax.random.normal(k_table, (vocab, embed_dim), dtype=jnp.float32) * 0.02
    ).astype(jnp.bfloat16)
    labels = jax.random.randint(k_labels, (batch,), 0, num_classes, dtype=jnp.int32)

    # 1) Train mode: CFG token drop + vectorized one-hot gather (single D tile).
    out, drop_ids = label_embed_forward(
        labels, embedding_table,
        num_classes=num_classes, dropout_prob=dropout_prob,
        train=True, rng=k_drop,
    )
    out = jax.block_until_ready(out)
    dropped = jnp.where(drop_ids == 1, num_classes, labels)
    ref = jnp.take(embedding_table, dropped, axis=0)
    assert out.shape == (batch, embed_dim)
    assert out.dtype == embedding_table.dtype
    assert jnp.array_equal(out, ref), "train-mode mismatch vs reference"

    # 2) Eval mode (no dropout path).
    out_eval, _ = label_embed_forward(
        labels, embedding_table,
        num_classes=num_classes, dropout_prob=dropout_prob, train=False,
    )
    out_eval = jax.block_until_ready(out_eval)
    ref_eval = jnp.take(embedding_table, labels, axis=0)
    assert jnp.array_equal(out_eval, ref_eval), "eval-mode mismatch vs reference"

    # 3) Multi-step D tiling (force a tiny VMEM budget -> tile_d=128, 3 steps).
    out_tiled, _ = label_embed_forward(
        labels, embedding_table,
        num_classes=num_classes, dropout_prob=dropout_prob, train=False,
        vmem_budget_bytes=20_000,
    )
    out_tiled = jax.block_until_ready(out_tiled)
    assert jnp.array_equal(out_tiled, ref_eval), "tiled-path mismatch vs reference"

    # 4) Manual HBM row-gather DMA path (large-vocab regime), forced here on the
    #    small demo shapes purely for coverage.
    out_dma, _ = label_embed_forward(
        labels, embedding_table,
        num_classes=num_classes, dropout_prob=dropout_prob, train=False,
        gather="dma",
    )
    out_dma = jax.block_until_ready(out_dma)
    assert jnp.array_equal(out_dma, ref_eval), "dma-path mismatch vs reference"

    print("KERNEL_OK")
</pallas_src>

<mosaic_0001>
module attributes {stable_mosaic.version = 11 : i64} {
  func.func @_onehot_gather_kernel(%arg0: i32, %arg1: memref<8x1xi32, #tpu.memory_space<vmem>>, %arg2: memref<11x384xbf16, #tpu.memory_space<vmem>>, %arg3: memref<8x384xbf16, #tpu.memory_space<vmem>>) attributes {dimension_semantics = [#tpu.dimension_semantics<arbitrary>], iteration_bounds = array<i64: 1>, scalar_prefetch = 0 : i64, scratch_operands = 0 : i64, tpu.core_type = #tpu.core_type<tc>, window_params = [{pipeline_mode = #tpu.pipeline_mode<synchronous>, transform_indices = @transform_0, window_bounds = array<i64: 8, 1>}, {transform_indices = @transform_1, window_bounds = array<i64: 11, 384>}, {transform_indices = @transform_2, window_bounds = array<i64: 8, 384>}]} {
    %0 = tpu.iota {dimensions = array<i32: 1>} : vector<8x11xi32>
    %c0 = arith.constant 0 : index
    %c0_0 = arith.constant 0 : index
    %1 = vector.load %arg1[%c0, %c0_0] : memref<8x1xi32, #tpu.memory_space<vmem>>, vector<8x1xi32>
    %2 = vector.broadcast %1 : vector<8x1xi32> to vector<8x11xi32>
    %3 = arith.cmpi eq, %0, %2 : vector<8x11xi32>
    %4 = arith.extui %3 : vector<8x11xi1> to vector<8x11xi32>
    %5 = arith.sitofp %4 : vector<8x11xi32> to vector<8x11xf32>
    %6 = arith.truncf %5 : vector<8x11xf32> to vector<8x11xbf16>
    %c0_1 = arith.constant 0 : index
    %c0_2 = arith.constant 0 : index
    %7 = vector.load %arg2[%c0_1, %c0_2] : memref<11x384xbf16, #tpu.memory_space<vmem>>, vector<11x384xbf16>
    %cst = arith.constant dense<0.000000e+00> : vector<8x384xf32>
    %8 = tpu.matmul %6, %7, %cst {dimension_numbers = #tpu.dot_dimension_numbers<[1], [0], [0], [1], [0, 0, 1, 1], [], []>} : vector<8x11xbf16>, vector<11x384xbf16>, vector<8x384xf32> -> vector<8x384xf32>
    %9 = arith.truncf %8 : vector<8x384xf32> to vector<8x384xbf16>
    %c0_3 = arith.constant 0 : index
    %c0_4 = arith.constant 0 : index
    %10 = vector.load %arg3[%c0_3, %c0_4] : memref<8x384xbf16, #tpu.memory_space<vmem>>, vector<8x384xbf16>
    tpu.vector_store %arg3[%c0_3, %c0_4], %9 {strides = array<i32>} : memref<8x384xbf16, #tpu.memory_space<vmem>>, vector<8x384xbf16>,
    return
  }
  func.func @transform_0(%arg0: i32) -> (i32, i32) {
    %c0_i32 = arith.constant 0 : i32
    %c0_i32_0 = arith.constant 0 : i32
    %c0_i32_1 = arith.constant 0 : i32
    return %c0_i32, %c0_i32_0 : i32, i32
  }
  func.func @transform_1(%arg0: i32) -> (i32, i32) {
    %c0_i32 = arith.constant 0 : i32
    %c0_i32_0 = arith.constant 0 : i32
    return %c0_i32, %arg0 : i32, i32
  }
  func.func @transform_2(%arg0: i32) -> (i32, i32) {
    %c0_i32 = arith.constant 0 : i32
    %c0_i32_0 = arith.constant 0 : i32
    return %c0_i32, %arg0 : i32, i32
  }
}

</mosaic_0001>

<bundles_post_ra>
// kernel: tpu_custom_call.1
= control target key start
LH: loop header
LB: loop body
LE: loop exit
PB: predicated region body
PF: predicated region fallthrough
CT: control target
= control target key end

     0   :  { %7 = vsyncpa [#allocation3], 0  ;;  %s311_s0 = inlined_call_operand.vmem [shape: s32[8,1], index: 0, kind: input, shape index: {}]   ;;  %s312_s1 = inlined_call_operand.hbm [shape: bf16[11,384], index: 1, kind: input, shape index: {}]   ;;  %s313_s2 = inlined_call_operand.hbm [shape: bf16[8,384], index: 2, kind: output, shape index: {}]  }
   0x1   :  { %8 = vsyncpa [#allocation4], 0  ;;  %s261_s9 = smov [#allocation2]   ;;  %s213_s13 = scalar_lea.hbm %s312_s1, 384 }
   0x2   :  { %s16_s10 = sshll.u32 %s261_s9, 4  ;;  %p214_p0 = scmp.ne.s32.totalorder %s312_s1, %s213_s13  ;;  %s17_s10 = int_to_ptr.vmem [resolvable:$true] %s16_s10 }
   0x3   :  { %p217_p1 = scmp.lt.u32.totalorder %s213_s13, %s312_s1 }
   0x5   :  { %p219_p2 = pnand %p217_p1, %p214_p0 }
   0x7   :  { %222 = shalt.err (!%p219_p2)
}
   0x8   :  { %s223_s18 = scalar_lea.vmem %s17_s10, 384  ;;  %p228_p4 = scmp.lt.s32.totalorder %s17_s10, %s17_s10 }
   0x9   :  { %p224_p3 = scmp.ne.s32.totalorder %s17_s10, %s223_s18  ;;  %p229_p5 = scmp.lt.s32.totalorder %s223_s18, %s223_s18 }
   0xb   :  { %p230_p6 = por %p229_p5, %p228_p4 }
   0xd   :  { %p231_p7 = pnand %p230_p6, %p224_p3 }
   0xf   :  { %234 = shalt.err (!%p231_p7)
}
  0x10   :  { %s262_s19 = smov 192   ;;  %s263_s20 = smov 12  }
  0x11   :  { %22 = dma.hbm_to_vmem [thread:$0]  %s312_s1, 384, %s17_s10, [#allocation3], %s262_s19, %s262_s19, %s263_s20  }
  0x12   :  { %257 = dma.done.wait [#allocation3], 384  }
  0x13   :  { %258 = vsyncadd [#allocation3], 4294966912  ;;  %v264_v0 = vmov 0   ;;  %v265_v1 = vmov 0.0   ;;  %vm58_vm0 = vcmask 1044480   ;;  %vm59_vm1 = vcmask 1045504  }
  0x14   :  { %208 = vset.pattern.permute.xlu0 %v264_v0  ;;  %194 = vmatprep.subr.bf16.mxu1 %v265_v1  ;;  %v266_v2 = vmov 65535   ;;  %v29_v4 = vld [vmem:[%s311_s0] sm:$0xff]  ;;  %v212_v10 = vld [vmem:[#allocation2 + $0x8] ss:$12 sps:$4 sm:$0x3f]   ;;  %vm267_vm2 = vmmov 0   ;;  %v27_v12 = vlaneseq }
  0x15   :  { %103 = vmatprep.mubr.bf16.mxu0 %v264_v0  ;;  %v60_v3 = vsel %vm58_vm0, 4294967295, %v266_v2  ;;  %31 = vperm.xlu0 %208, %v29_v4   ;;  %v209_v6 = vld [vmem:[#allocation2 + $0x4] ss:$12 sps:$4 sm:$0x3f]   ;;  %vm54_vm4 = vcmask 89088   ;;  %s268_s0 = smov [#allocation5]  }
  0x16   :  { %v61_v5 = vsel %vm59_vm1, %v60_v3, 0  ;;  %v211_v7 = vld [vmem:[#allocation2] ss:$12 sps:$4 sm:$0x3f]   ;;  %196 = vmatprep.mubr.msk.bf16.mxu1 %vm267_vm2, %v265_v1  ;;  %v28_v13 = vand.u32 127, %v27_v12  ;;  %s173_s1 = sshll.u32 %s268_s0, 4  ;;  %s174_s1 = int_to_ptr.vmem [resolvable:$true] %s173_s1 }
  0x17   :  { %v66_v8 = vand.u32 %v209_v6, %v61_v5  ;;  %v63_v9 = vand.u32 %v211_v7, %v61_v5  ;;  %v69_v11 = vand.u32 %v212_v10, %v61_v5  ;;  %s235_s25 = scalar_lea.vmem %s174_s1, 192  ;;  %p240_p9 = scmp.lt.s32.totalorder %s174_s1, %s174_s1 }
  0x18   :  { %p236_p8 = scmp.ne.s32.totalorder %s174_s1, %s235_s25  ;;  %p241_p10 = scmp.lt.s32.totalorder %s235_s25, %s235_s25 }
  0x19   :  { %71 = vmatprep.subr.bf16.mxu0 %v66_v8  ;;  %195 = vmatpush3.bf16.msra.mxu1 %v69_v11 }
  0x1a   :  { %72 = vmatpush1.bf16.msra.mxu0 %v63_v9  ;;  %p242_p11 = por %p241_p10, %p240_p9 }
  0x1c   :  { %p243_p12 = pnand %p242_p11, %p236_p8 }
  0x94   :  { %v32_v14 = vpop.permute.xlu0 %31 }
  0x95   :  { %vm33_vm3 = vcmp.eq.s32.totalorder %v28_v13, %v32_v14 }
  0x96   :  { %v182_v15 = vsel %vm33_vm3, 1.0, %v265_v1 }
  0x97   :  { %v36_v16 = vpack.c.bf16 %v182_v15, %v182_v15 }
  0x99   :  { %186 = vmatmul.mubr.msk.bf16.vlgmr.msra.gmra.mrb[0].mxu0 %vm54_vm4, %v36_v16  ;;  %197 = vmatmul.mubr.msk.bf16.vlgmr.msra.gmra.mrb[0].mxu1 %vm54_vm4, %v36_v16 }
 0x16c   :  { %v105_v17 = vpop.f32.mrb[0].mxu0  ;;  %v146_v18 = vpop.f32.mrb[0].mxu1 }
 0x16d   :  { %v191_v19 = vpack.c.bf16 %v146_v18, %v146_v18  ;;  %v107_v20 = vpop.f32.mrb[1].mxu0  ;;  %v198_v21 = vpop.f32.mrb[1].mxu1 }
 0x16e   :  { %v190_v22 = vpack.c.bf16 %v107_v20, %v105_v17  ;;  %v109_v23 = vpop.f32.mrb[2].mxu0  ;;  %v149_v24 = vpop.f32.mrb[2].mxu1 }
 0x16f   :  { %166 = vst [vmem:[#allocation5 + $0x8] sm:$0xf] %v191_v19  ;;  %v110_v25 = vpop.f32.mrb[3].mxu0  ;;  %v199_v26 = vpop.f32.mrb[3].mxu1 }
 0x170   :  { %165 = vst [vmem:[#allocation5] sm:$0xff] %v190_v22 }
 0x171   :  { %246 = shalt.err (!%p243_p12)
}
 0x172   :  { %s247_s28 = scalar_lea.hbm %s313_s2, 192 }
 0x173   :  { %p248_p13 = scmp.ne.s32.totalorder %s313_s2, %s247_s28  ;;  %p251_p0 = scmp.lt.u32.totalorder %s247_s28, %s313_s2 }
 0x175   :  { %p253_p1 = pnand %p251_p0, %p248_p13 }
 0x177   :  { %256 = shalt.err (!%p253_p1)
}
 0x178   :  { %176 = dma.vmem_to_hbm [thread:$0]  %s174_s1, 192, %s313_s2, [#allocation4]  }
 0x179   :  { %259 = dma.done.wait [#allocation4], 192  }
 0x17a   :  { %260 = vsyncadd [#allocation4], 4294967104 }
 0x17b   :  { %180 = vsyncpa [#allocation3], 1 }
 0x17c   :  { %181 = vsyncpa [#allocation4], 1 }

</bundles_post_ra>
